<compile_context>
chip_gen: v6e
topology: v6e:2x2x1
jax: 0.10.0
libtpu: 0.0.40
codegen_flags: <defaults>
</compile_context>

<pallas_src>
import functools
import math

import jax
import jax.numpy as jnp
from jax.experimental import pallas as pl
from jax.experimental.pallas import tpu as pltpu


def _chunk_partial_sums(x, t, approx):
    """x, t: (rows, 128) float32 -> (4, 128) partial sums.

    Row 0: sum(sigmoid(x) * t), row 1: sum(sigmoid(x)), row 2: sum(t),
    row 3: sum(BCE-with-logits elements).  One shared exp(-|x|) feeds both the
    sigmoid and the numerically-stable BCE term.
    """
    e = jnp.exp(-jnp.abs(x))                 # exp(-|x|) in (0, 1]
    one_pe = 1.0 + e
    num = jnp.where(x >= 0.0, 1.0, e)        # sigmoid numerator
    if approx:
        sig = num * pl.reciprocal(one_pe, approx=True)
    else:
        sig = num / one_pe
    bce = jnp.maximum(x, 0.0) - x * t + jnp.log(one_pe)
    return jnp.concatenate(
        [
            jnp.sum(sig * t, axis=0, keepdims=True),
            jnp.sum(sig, axis=0, keepdims=True),
            jnp.sum(t, axis=0, keepdims=True),
            jnp.sum(bce, axis=0, keepdims=True),
        ],
        axis=0,
    )


def _combined_loss_kernel(p_ref, t_ref, o_ref, *, tile_rows, last_rows, n_tiles,
                          chunk_rows, approx):
    """Grid = (B * n_split, n_tiles).

    p_ref, t_ref : (1, tile_rows, 128) VMEM tiles of logits / targets (any dtype)
    o_ref        : (1, 4, 128) per-(batch-split) resident accumulator block.
    """
    j = pl.program_id(1)

    def tile_sums(nrows):
        # nrows is a static Python int -> no masking needed anywhere.
        n_full, tail = divmod(nrows, chunk_rows)
        acc = jnp.zeros((4, 128), jnp.float32)

        def load(start, rows):
            x = p_ref[0, pl.ds(start, rows), :].astype(jnp.float32)
            t = t_ref[0, pl.ds(start, rows), :].astype(jnp.float32)
            return x, t

        if n_full:
            def body(c, a):
                start = pl.multiple_of(c * chunk_rows, chunk_rows)
                x, t = load(start, chunk_rows)
                return a + _chunk_partial_sums(x, t, approx)

            acc = jax.lax.fori_loop(0, n_full, body, acc)
        if tail:
            x, t = load(n_full * chunk_rows, tail)
            acc = acc + _chunk_partial_sums(x, t, approx)
        return acc

    @pl.when(j == 0)
    def _():
        o_ref[...] = jnp.zeros_like(o_ref)

    if last_rows == tile_rows:
        # Uniform tiles: one code path, no branches beyond the init.
        o_ref[0] = o_ref[0] + tile_sums(tile_rows)
    else:
        @pl.when(j < n_tiles - 1)
        def _():
            o_ref[0] = o_ref[0] + tile_sums(tile_rows)

        @pl.when(j == n_tiles - 1)
        def _():
            o_ref[0] = o_ref[0] + tile_sums(last_rows)


def binary_combined_loss(preds, targets, *, weight_dice=0.5, weight_ce=0.5,
                         smooth=1.0, tile_rows=None, n_split=None,
                         approx_recip=False):
    """Pallas implementation of BinaryCombinedLoss.forward (returns f32 scalar)."""
    B = preds.shape[0]
    N = math.prod(preds.shape[1:])
    lane = 128
    chunk_rows = 512

    p2 = preds.reshape(B, N)
    t2 = targets.reshape(B, N)
    m_rows = N // lane                        # full 128-lane rows per batch
    r = N - m_rows * lane                     # ragged lane remainder (< 128)

    if m_rows > 0:
        if r:
            # TODO(synk): producers should emit 128-aligned flattened buffers;
            # for ragged N this slice may cost one XLA copy, but the <=127-elem
            # per-batch tail itself is handled below with plain jnp (no pad).
            p_main = p2[:, : m_rows * lane]
            t_main = t2[:, : m_rows * lane]
        else:
            p_main = p2
            t_main = t2

        # Optionally split each batch's rows so the "parallel" grid axis has
        # enough entries to keep both v7x TensorCores busy for small / odd B.
        if n_split is None:
            n_split = 1
            while (B * n_split < 8 and m_rows % (2 * n_split) == 0
                   and m_rows // (2 * n_split) >= 2 * chunk_rows):
                n_split *= 2
        elif m_rows % n_split:
            raise ValueError("n_split must divide N // 128")

        ms = m_rows // n_split                # rows per (batch, split)
        Bs = B * n_split
        p3 = p_main.reshape(Bs, ms, lane)     # free reshape (no copy)
        t3 = t_main.reshape(Bs, ms, lane)

        # Sublane-packing multiple for the narrowest input dtype (f32->8,
        # bf16->16, int8/bool->32); full-dim blocks are always legal.
        min_item = min(p3.dtype.itemsize, t3.dtype.itemsize, 4)
        pack = 32 // min_item
        if tile_rows is None:
            # ~4 MiB per input block; multiple of chunk_rows (and of pack).
            max_item = max(p3.dtype.itemsize, t3.dtype.itemsize)
            tr = (4 * 1024 * 1024) // (lane * max_item)
        else:
            tr = max(pack, ((tile_rows + pack - 1) // pack) * pack)
        if ms <= tr:
            tr = ms
            n_tiles = 1
        else:
            n_tiles = (ms + tr - 1) // tr
        last_rows = ms - (n_tiles - 1) * tr

        kernel = functools.partial(
            _combined_loss_kernel,
            tile_rows=tr, last_rows=last_rows, n_tiles=n_tiles,
            chunk_rows=chunk_rows, approx=approx_recip)

        total = Bs * ms * lane
        cost = pl.CostEstimate(
            flops=14 * total,
            transcendentals=2 * total,
            bytes_accessed=total * (p3.dtype.itemsize + t3.dtype.itemsize)
            + Bs * 4 * lane * 4)

        out = pl.pallas_call(
            kernel,
            out_shape=jax.ShapeDtypeStruct((Bs, 4, lane), jnp.float32),
            grid_spec=pltpu.PrefetchScalarGridSpec(
                num_scalar_prefetch=0,
                grid=(Bs, n_tiles),
                in_specs=[
                    pl.BlockSpec((1, tr, lane), lambda b, j: (b, j, 0)),
                    pl.BlockSpec((1, tr, lane), lambda b, j: (b, j, 0)),
                ],
                out_specs=pl.BlockSpec((1, 4, lane), lambda b, j: (b, 0, 0)),
            ),
            compiler_params=pltpu.CompilerParams(
                dimension_semantics=("parallel", "arbitrary"),
                vmem_limit_bytes=32 * 1024 * 1024,
            ),
            cost_estimate=cost,
        )(p3, t3)

        sums = jnp.sum(out, axis=-1).reshape(B, n_split, 4).sum(axis=1)  # (B, 4)
    else:
        sums = jnp.zeros((B, 4), jnp.float32)

    if r:
        # Tiny (< 128 elems per batch) lane remainder: plain-jnp epilogue.
        xt = p2[:, m_rows * lane:].astype(jnp.float32)
        tt = t2[:, m_rows * lane:].astype(jnp.float32)
        sig = jax.nn.sigmoid(xt)
        bce = jnp.maximum(xt, 0.0) - xt * tt + jnp.log1p(jnp.exp(-jnp.abs(xt)))
        tail = jnp.stack(
            [jnp.sum(sig * tt, axis=-1), jnp.sum(sig, axis=-1),
             jnp.sum(tt, axis=-1), jnp.sum(bce, axis=-1)], axis=-1)
        sums = sums + tail

    inter, sum_p, sum_t, bce_sum = (sums[:, 0], sums[:, 1], sums[:, 2], sums[:, 3])
    dice_coeff = (2.0 * inter + smooth) / (sum_p + sum_t + smooth)
    dice_loss = 1.0 - jnp.mean(dice_coeff)
    ce_loss = jnp.sum(bce_sum) / (B * N)
    return weight_ce * ce_loss + weight_dice * dice_loss


def _reference_combined_loss(preds, targets, weight_dice=0.5, weight_ce=0.5,
                             smooth=1.0):
    x = preds.astype(jnp.float32)
    t = targets.astype(jnp.float32)
    B = x.shape[0]
    p = jax.nn.sigmoid(x).reshape(B, -1)
    tf = t.reshape(B, -1)
    inter = jnp.sum(p * tf, axis=-1)
    dice = (2.0 * inter + smooth) / (jnp.sum(p, axis=-1) + jnp.sum(tf, axis=-1) + smooth)
    dice_loss = 1.0 - jnp.mean(dice)
    ce = jnp.mean(jnp.maximum(x, 0.0) - x * tf.reshape(x.shape)
                  + jnp.log1p(jnp.exp(-jnp.abs(x))))
    return weight_ce * ce + weight_dice * dice_loss


if __name__ == "__main__":
    key = jax.random.PRNGKey(0)

    def make_inputs(shape, seed, dtype=jnp.float32):
        k1, k2 = jax.random.split(jax.random.fold_in(key, seed))
        preds = jax.random.normal(k1, shape, dtype=jnp.float32).astype(dtype)
        targets = (jax.random.uniform(k2, shape) > 0.5).astype(dtype)
        return preds, targets

    def check(shape, seed, *, dtype=jnp.float32, atol=1e-5, rtol=1e-5, **kw):
        preds, targets = make_inputs(shape, seed, dtype)
        loss = jax.block_until_ready(binary_combined_loss(preds, targets, **kw))
        ref = _reference_combined_loss(preds, targets)
        assert jnp.allclose(loss, ref, atol=atol, rtol=rtol), (shape, kw, loss, ref)

    # NCHW like the PyTorch module: N = C*H*W = 1024, lane-aligned, single tile.
    check((2, 4, 16, 16), 0)
    # Ragged N = 300 (N % 128 != 0): aligned part in-kernel, 44-elem jnp tail.
    check((2, 3, 10, 10), 1)
    # Multi row-tile reduction with a ragged last tile (rows 64 -> 24/24/16),
    # exercising the resident accumulator + static partial-tile path.
    check((2, 8, 32, 32), 2, tile_rows=24)
    # bf16 inputs: kernel widens in-register (halves HBM traffic).
    check((2, 4, 16, 16), 3, dtype=jnp.bfloat16)
    # Forced reduction-axis split (keeps both v7x TensorCores busy for small B).
    check((2, 8, 32, 32), 4, n_split=2)
    # Exercises the chunked fori_loop path (1024 rows -> 2 x 512-row chunks).
    check((2, 8, 128, 128), 5)
    # Approximate-reciprocal sigmoid (v7x EUP/VPU saving); looser tolerance.
    check((2, 8, 32, 32), 6, approx_recip=True, atol=2e-3, rtol=2e-3)

    print("KERNEL_OK")
</pallas_src>

<mosaic_0001>
module attributes {stable_mosaic.version = 11 : i64} {
  func.func @_combined_loss_kernel(%arg0: i32, %arg1: i32, %arg2: memref<1x8x128xf32, #tpu.memory_space<vmem>>, %arg3: memref<1x8x128xf32, #tpu.memory_space<vmem>>, %arg4: memref<1x4x128xf32, #tpu.memory_space<vmem>>) attributes {dimension_semantics = [#tpu.dimension_semantics<parallel>, #tpu.dimension_semantics<arbitrary>], iteration_bounds = array<i64: 2, 1>, scalar_prefetch = 0 : i64, scratch_operands = 0 : i64, tpu.core_type = #tpu.core_type<tc>, window_params = [{transform_indices = @transform_0, window_bounds = array<i64: 1, 8, 128>}, {transform_indices = @transform_1, window_bounds = array<i64: 1, 8, 128>}, {transform_indices = @transform_2, window_bounds = array<i64: 1, 4, 128>}]} {
    %c0_i32 = arith.constant 0 : i32
    %0 = arith.cmpi eq, %arg1, %c0_i32 : i32
    %1 = arith.extui %0 : i1 to i32
    %c0_i32_0 = arith.constant 0 : i32
    %2 = arith.cmpi ne, %1, %c0_i32_0 : i32
    scf.if %2 {
      %cst_21 = arith.constant 0.000000e+00 : f32
      %42 = vector.broadcast %cst_21 : f32 to vector<1x4x128xf32>
      %c0_22 = arith.constant 0 : index
      %c0_23 = arith.constant 0 : index
      %c0_24 = arith.constant 0 : index
      %43 = vector.load %arg4[%c0_22, %c0_23, %c0_24] : memref<1x4x128xf32, #tpu.memory_space<vmem>>, vector<1x4x128xf32>
      tpu.vector_store %arg4[%c0_22, %c0_23, %c0_24], %42 {strides = array<i32>} : memref<1x4x128xf32, #tpu.memory_space<vmem>>, vector<1x4x128xf32>,
    } else {
    }
    %c0 = arith.constant 0 : index
    %c0_1 = arith.constant 0 : index
    %c0_2 = arith.constant 0 : index
    %3 = vector.load %arg4[%c0, %c0_1, %c0_2] : memref<1x4x128xf32, #tpu.memory_space<vmem>>, vector<1x4x128xf32>
    %4 = vector.shape_cast %3 : vector<1x4x128xf32> to vector<4x128xf32>
    %cst = arith.constant 0.000000e+00 : f32
    %5 = vector.broadcast %cst : f32 to vector<4x128xf32>
    %c0_3 = arith.constant 0 : index
    %c0_4 = arith.constant 0 : index
    %c0_5 = arith.constant 0 : index
    %6 = vector.load %arg2[%c0_3, %c0_4, %c0_5] : memref<1x8x128xf32, #tpu.memory_space<vmem>>, vector<1x8x128xf32>
    %7 = vector.shape_cast %6 : vector<1x8x128xf32> to vector<8x128xf32>
    %c0_6 = arith.constant 0 : index
    %c0_7 = arith.constant 0 : index
    %c0_8 = arith.constant 0 : index
    %8 = vector.load %arg3[%c0_6, %c0_7, %c0_8] : memref<1x8x128xf32, #tpu.memory_space<vmem>>, vector<1x8x128xf32>
    %9 = vector.shape_cast %8 : vector<1x8x128xf32> to vector<8x128xf32>
    %10 = math.absf %7 : vector<8x128xf32>
    %cst_9 = arith.constant 0.000000e+00 : f32
    %11 = vector.broadcast %cst_9 : f32 to vector<8x128xf32>
    %12 = arith.subf %11, %10 : vector<8x128xf32>
    %13 = math.exp %12 : vector<8x128xf32>
    %cst_10 = arith.constant 1.000000e+00 : f32
    %14 = vector.broadcast %cst_10 : f32 to vector<8x128xf32>
    %15 = arith.addf %14, %13 : vector<8x128xf32>
    %cst_11 = arith.constant 0.000000e+00 : f32
    %16 = vector.broadcast %cst_11 : f32 to vector<8x128xf32>
    %17 = arith.cmpf oge, %7, %16 : vector<8x128xf32>
    %cst_12 = arith.constant 1.000000e+00 : f32
    %18 = vector.broadcast %cst_12 : f32 to vector<8x128xf32>
    %19 = arith.select %17, %18, %13 : vector<8x128xi1>, vector<8x128xf32>
    %20 = arith.divf %19, %15 : vector<8x128xf32>
    %cst_13 = arith.constant 0.000000e+00 : f32
    %21 = vector.broadcast %cst_13 : f32 to vector<8x128xf32>
    %22 = arith.maximumf %7, %21 : vector<8x128xf32>
    %23 = arith.mulf %7, %9 : vector<8x128xf32>
    %24 = arith.subf %22, %23 : vector<8x128xf32>
    %25 = math.log %15 : vector<8x128xf32>
    %26 = arith.addf %24, %25 : vector<8x128xf32>
    %27 = arith.mulf %20, %9 : vector<8x128xf32>
    %cst_14 = arith.constant dense<0.000000e+00> : vector<128xf32>
    %28 = vector.multi_reduction <add>, %27, %cst_14 [0] : vector<8x128xf32> to vector<128xf32>
    %29 = vector.shape_cast %28 : vector<128xf32> to vector<1x128xf32>
    %cst_15 = arith.constant dense<0.000000e+00> : vector<128xf32>
    %30 = vector.multi_reduction <add>, %20, %cst_15 [0] : vector<8x128xf32> to vector<128xf32>
    %31 = vector.shape_cast %30 : vector<128xf32> to vector<1x128xf32>
    %cst_16 = arith.constant dense<0.000000e+00> : vector<128xf32>
    %32 = vector.multi_reduction <add>, %9, %cst_16 [0] : vector<8x128xf32> to vector<128xf32>
    %33 = vector.shape_cast %32 : vector<128xf32> to vector<1x128xf32>
    %cst_17 = arith.constant dense<0.000000e+00> : vector<128xf32>
    %34 = vector.multi_reduction <add>, %26, %cst_17 [0] : vector<8x128xf32> to vector<128xf32>
    %35 = vector.shape_cast %34 : vector<128xf32> to vector<1x128xf32>
    %36 = tpu.concatenate %29, %31, %33, %35 in 0 : vector<1x128xf32>, vector<1x128xf32>, vector<1x128xf32>, vector<1x128xf32> -> vector<4x128xf32>
    %37 = arith.addf %5, %36 : vector<4x128xf32>
    %38 = arith.addf %4, %37 : vector<4x128xf32>
    %c0_18 = arith.constant 0 : index
    %c0_19 = arith.constant 0 : index
    %c0_20 = arith.constant 0 : index
    %39 = vector.load %arg4[%c0_18, %c0_19, %c0_20] : memref<1x4x128xf32, #tpu.memory_space<vmem>>, vector<1x4x128xf32>
    %40 = vector.shape_cast %39 : vector<1x4x128xf32> to vector<4x128xf32>
    %41 = vector.shape_cast %38 : vector<4x128xf32> to vector<1x4x128xf32>
    tpu.vector_store %arg4[%c0_18, %c0_19, %c0_20], %41 {strides = array<i32>} : memref<1x4x128xf32, #tpu.memory_space<vmem>>, vector<1x4x128xf32>,
    return
  }
  func.func @transform_0(%arg0: i32, %arg1: i32) -> (i32, i32, i32) {
    %c0_i32 = arith.constant 0 : i32
    %c0_i32_0 = arith.constant 0 : i32
    return %arg0, %arg1, %c0_i32 : i32, i32, i32
  }
  func.func @transform_1(%arg0: i32, %arg1: i32) -> (i32, i32, i32) {
    %c0_i32 = arith.constant 0 : i32
    %c0_i32_0 = arith.constant 0 : i32
    return %arg0, %arg1, %c0_i32 : i32, i32, i32
  }
  func.func @transform_2(%arg0: i32, %arg1: i32) -> (i32, i32, i32) {
    %c0_i32 = arith.constant 0 : i32
    %c0_i32_0 = arith.constant 0 : i32
    %c0_i32_1 = arith.constant 0 : i32
    return %arg0, %c0_i32, %c0_i32_0 : i32, i32, i32
  }
}

</mosaic_0001>

<bundles_post_ra>
// kernel: tpu_custom_call.1
= control target key start
LH: loop header
LB: loop body
LE: loop exit
PB: predicated region body
PF: predicated region fallthrough
CT: control target
= control target key end

     0   :  { %7 = vsyncpa [#allocation3], 0  ;;  %s807_s0 = inlined_call_operand.hbm [shape: f32[2,8,128], index: 0, kind: input, shape index: {}]   ;;  %s808_s1 = inlined_call_operand.hbm [shape: f32[2,8,128], index: 1, kind: input, shape index: {}]   ;;  %s809_s2 = inlined_call_operand.hbm [shape: f32[2,4,128], index: 2, kind: output, shape index: {}]  }
   0x1   :  { %9 = vsyncpa [#allocation3 + $0x1], 0 }
   0x2   :  { %10 = vsyncpa [#allocation6], 0 }
   0x3   :  { %12 = vsyncpa [#allocation6 + $0x1], 0 }
   0x4   :  { %13 = vsyncpa [#allocation4], 0 }
   0x5   :  { %15 = vsyncpa [#allocation4 + $0x1], 0  ;;  %s639_s9 = smov 0   ;;  %s641_s10 = smov 0  }
   0x6   :  { %s643_s11 = smov 0   ;;  %s645_s12 = smov 0  }
   0x7   :  { %s647_s13 = smov 0   ;;  %s649_s14 = smov 0  }
   0x8 LB: > { %s388_s15 = sadd.s32 4294967295, %s618_s14   ;;  %s389_s16 = sadd.s32 4294967294, %s618_s14   ;;  %s618_s14 = sphi %s649_s14, %s21_s14   ;;  %s614_s13 = sphi %s647_s13, %s821_s13   ;;  %s610_s12 = sphi %s645_s12, %s820_s12   ;;  %s606_s11 = sphi %s643_s11, %s819_s11   ;;  %s602_s10 = sphi %s641_s10, %s818_s10   ;;  %s598_s9 = sphi %s639_s9, %s817_s9  }
   0x9   : > { %s33_s17 = sadd.s32 1, %s614_s13  ;;  %s42_s18 = sadd.s32 1, %s606_s11 }
   0xa   : > { %p35_p0 = scmp.ge.s32.totalorder %s33_s17, 2  ;;  %p49_p1 = scmp.ne.s32.totalorder %s606_s11, %s602_s10 }
   0xb   : > { %p50_p2 = scmp.eq.s32.totalorder %s618_s14, 0  ;;  %p55_p3 = scmp.ne.s32.totalorder %s602_s10, %s598_s9 }
   0xc   : > { %s823_s17 = smov (%p35_p0, %s33_s17), 0  ;;  %p56_p5 = scmp.eq.s32.totalorder %s388_s15, 0 }
   0xd   : > { %p680_p4 = por %p50_p2, %p49_p1  ;;  %s37_s20 = ssub.s32 %s614_s13, %s823_s17 }
   0xe   : > { %p107_p6 = scmp.eq.s32.totalorder %s388_s15, 1  ;;  %p40_p7 = scmp.eq.s32.totalorder %s37_s20, 0 }
   0xf   : > { %p686_p8 = por %p56_p5, %p55_p3  ;;  %p113_p10 = scmp.eq.s32.totalorder %s389_s16, 1 }
  0x10   : > { %p690_p9 = por %p107_p6, %p49_p1  ;;  %p421_p13 = scmp.lt.s32.totalorder %s618_s14, 2 }
  0x11   : > { %s695_s23 = scalar_select %p40_p7, %s606_s11, %s42_s18  }
  0x12   : > { %p697_p11 = por %p113_p10, %p55_p3  ;;  %s704_s25 = sand.u32 1, %s606_s11  }
  0x13   : > { %s392_s26 = sshll.u32 %s704_s25, 3  ;;  %s393_s27 = sshll.u32 %s614_s13, 7 }
  0x14   : > { %s143_s30 = scalar_lea.hbm %s807_s0, %s393_s27  ;;  %s137_s3 = scalar_lea.vmem [#allocation2], %s392_s26 }
  0x15   : > { %s145_s4 = sshll.u32 %s137_s3, 4  ;;  %p713_p0 = pnand %p421_p13, %p680_p4  ;;  %s146_s4 = int_to_ptr.vmem [resolvable:$true] %s145_s4 }
  0x16   : > { %p396_p1 = scmp.ge.s32.totalorder %s618_s14, 1  ;;  %p169_p2 = scmp.lt.s32.totalorder %s618_s14, 3 }
  0x17   : > { %s134_s6 = scalar_lea.sflag [#allocation3], %s704_s25  ;;  %p480_p3 = pneg %p713_p0 }
  0x18   : > { %s491_s7 = scalar_lea.vmem %s146_s4, 128  ;;  %s620_s8 = smov [#allocation2]  }
  0x19   : > { %p492_p5 = scmp.ne.s32.totalorder %s146_s4, %s491_s7  ;;  %s496_s15 = sshll.u32 %s620_s8, 4  ;;  %s497_s15 = int_to_ptr.vmem [resolvable:$false] %s496_s15 }
  0x1a   : > { %s498_s16 = scalar_lea.vmem %s497_s15, 256  ;;  %p499_p4 = scmp.lt.s32.totalorder %s146_s4, %s497_s15 }
  0x1b   : > { %p494_p6 = pnand %p492_p5, %p480_p3  ;;  %p500_p10 = scmp.lt.s32.totalorder %s498_s16, %s491_s7 }
  0x1d   : > { %p495_p7 = pneg %p494_p6  ;;  %p501_p13 = por %p500_p10, %p499_p4 }
  0x1f   : > { %p502_p12 = pnand %p501_p13, %p495_p7 }
  0x21   : > { %505 = shalt.err (!%p502_p12)
}
  0x22   : > { %413 = dma.hbm_to_vmem [thread:$0]  (!%p713_p0), %s143_s30, 128, %s146_s4, %s134_s6  }
  0x23   : > { %p731_p5 = pnand %p396_p1, %p169_p2  ;;  %s162_s28 = scalar_lea.hbm %s808_s1, %s393_s27 }
  0x24   : > { %s156_s29 = scalar_lea.vmem [#allocation5], %s392_s26  ;;  %s153_s7 = scalar_lea.sflag [#allocation6], %s704_s25 }
  0x25   : > { %s164_s3 = sshll.u32 %s156_s29, 4  ;;  %s621_s30 = smov [#allocation5]   ;;  %s165_s3 = int_to_ptr.vmem [resolvable:$true] %s164_s3 }
  0x26   : > { %s519_s8 = scalar_lea.vmem %s165_s3, 128  ;;  %s524_s4 = sshll.u32 %s621_s30, 4  ;;  %s525_s4 = int_to_ptr.vmem [resolvable:$false] %s524_s4 }
  0x27   : > { %p520_p12 = scmp.ne.s32.totalorder %s165_s3, %s519_s8  ;;  %s526_s6 = scalar_lea.vmem %s525_s4, 256 }
  0x28   : > { %p527_p1 = scmp.lt.s32.totalorder %s165_s3, %s525_s4  ;;  %p528_p2 = scmp.lt.s32.totalorder %s526_s6, %s519_s8 }
  0x29   : > { %p522_p6 = pnand %p520_p12, %p480_p3 }
  0x2a   : > { %p529_p4 = por %p528_p2, %p527_p1 }
  0x2b   : > { %p523_p7 = pneg %p522_p6 }
  0x2d   : > { %p530_p10 = pnand %p529_p4, %p523_p7 }
  0x2f   : > { %533 = shalt.err (!%p530_p10)
}
  0x30   : > { %416 = dma.hbm_to_vmem [thread:$0]  (!%p713_p0), %s162_s28, 128, %s165_s3, %s153_s7  }
  0x31   : > { %173 = sbr.rel (%p731_p5) target bundleno = 128 (0x80), region = 28  ;;  %s747_s25 = sand.u32 (!%p731_p5), 1, %s602_s10  }
  0x32   : > { %s397_s26 = sshll.u32 (!%p731_p5), %s747_s25, 3  ;;  %s176_s27 = scalar_lea.sflag (!%p731_p5), [#allocation3], %s747_s25 }
  0x33   : > { %s179_s15 = scalar_lea.vmem (!%p731_p5), [#allocation2], %s397_s26 }
  0x36   : > { %585 = dma.done.wait (%p686_p8), %s176_s27, 128  }
  0x37   : > { %587 = vsyncadd (%p686_p8), %s176_s27, 4294967168  ;;  %s185_s5 = scalar_lea.sflag [#allocation6], %s747_s25  ;;  %s188_s16 = scalar_lea.vmem [#allocation5], %s397_s26 }
  0x38   : > { %589 = dma.done.wait (%p686_p8), %s185_s5, 128  }
  0x39   : > { %591 = vsyncadd (%p686_p8), %s185_s5, 4294967168  ;;  %s399_s18 = sshll.u32 %s747_s25, 2  ;;  %v622_v0 = vmov 0.0   ;;  %v220_v1 = vld [vmem:[%s179_s15] sm:$0xff]  ;;  %v221_v7 = vld [vmem:[%s188_s16] sm:$0xff]  ;;  %vm262_vm1 = vcmask 1040384  }
  0x3a   : > { %s761_s19 = scalar_lea.vmem [#allocation7], %s399_s18  ;;  %v222_v2 = vand.u32 2147483647, %v220_v1  ;;  %v250_v8 = vrot.slane %v221_v7, 4  ;;  %vm227_vm0 = vcmp.ge.f32.partialorder %v220_v1, 0.0  ;;  %v231_v9 = vmax.f32 %v220_v1, 0.0 }
  0x3b   : > { %218 = vst [vmem:[%s761_s19] sm:$0xf] %v622_v0  ;;  %v232_v10 = vmul.f32 %v221_v7, %v220_v1  ;;  %vm264_vm2 = vcmask 1041408   ;;  %vm266_vm3 = vcmask 1042432   ;;  %s401_s21 = sshll.u32 %s610_s12, 6  ;;  %s285_s20 = sshll.u32 %s761_s19, 4  ;;  %s286_s20 = int_to_ptr.vmem [resolvable:$true] %s285_s20 }
  0x3c   : > { %v223_v3 = vsub.f32 0.0, %v222_v2  ;;  %v251_v12 = vadd.f32 %v250_v8, %v221_v7  ;;  %s283_s3 = scalar_lea.hbm %s809_s2, %s401_s21  ;;  %s272_s7 = scalar_lea.sflag [#allocation4], %s747_s25 }
  0x3d   : > { %v233_v14 = vsub.f32 %v231_v9, %v232_v10  ;;  %s534_s8 = scalar_lea.vmem %s286_s20, 64  ;;  %s623_s30 = smov [#allocation7]  }
  0x3e   : > { %v224_v4 = vmul.f32 1.442695, %v223_v3  ;;  %v252_v18 = vrot.slane %v251_v12, 2  ;;  %p535_p8 = scmp.ne.s32.totalorder %s286_s20, %s534_s8  ;;  %s538_s4 = sshll.u32 %s623_s30, 4  ;;  %s539_s4 = int_to_ptr.vmem [resolvable:$false] %s538_s4 }
  0x3f   : > { %s540_s12 = scalar_lea.vmem %s539_s4, 128  ;;  %p541_p13 = scmp.lt.s32.totalorder %s286_s20, %s539_s4 }
  0x40   : > { %472 = vpow2.f32 %v224_v4  ;;  %v253_v24 = vadd.f32 %v252_v18, %v251_v12  ;;  %p536_p0 = pnand %p535_p8, %p690_p9  ;;  %p542_p5 = scmp.lt.s32.totalorder %s540_s12, %s534_s8 }
  0x42   : > { %v254_v31 = vrot.slane %v253_v24, 1  ;;  %v219_v42 = vld [vmem:[%s761_s19] sm:$0xf]  ;;  %p537_p3 = pneg %p536_p0  ;;  %p543_p12 = por %p542_p5, %p541_p13 }
  0x44   : > { %v255_v38 = vadd.f32 %v254_v31, %v253_v24  ;;  %p544_p6 = pnand %p543_p12, %p537_p3 }
  0x4d   : > { %v473_v5 = vpop.eup %472 }
  0x4e   : > { %v226_v6 = vadd.f32 1.0, %v473_v5  ;;  %v228_v11 = vsel %vm227_vm0, 1.0, %v473_v5 }
  0x50   : > { %474 = vrcp.f32 %v226_v6 }
  0x51   : > { %476 = vlog2.f32 %v226_v6 }
  0x5d   : > { %v475_v13 = vpop.eup %474 }
  0x5e   : > { %v477_v15 = vpop.eup %476  ;;  %v230_v16 = vmul.f32 %v475_v13, %v228_v11 }
  0x5f   : > { %v235_v17 = vmul.f32 0.6931472, %v477_v15 }
  0x60   : > { %v237_v19 = vmul.f32 %v230_v16, %v221_v7  ;;  %v244_v20 = vrot.slane %v230_v16, 4 }
  0x61   : > { %v236_v21 = vadd.f32 %v235_v17, %v233_v14 }
  0x62   : > { %v238_v22 = vrot.slane %v237_v19, 4  ;;  %v245_v23 = vadd.f32 %v244_v20, %v230_v16 }
  0x63   : > { %v256_v25 = vrot.slane %v236_v21, 4 }
  0x64   : > { %v239_v26 = vadd.f32 %v238_v22, %v237_v19  ;;  %v246_v27 = vrot.slane %v245_v23, 2 }
  0x65   : > { %v257_v28 = vadd.f32 %v256_v25, %v236_v21 }
  0x66   : > { %v240_v29 = vrot.slane %v239_v26, 2  ;;  %v247_v30 = vadd.f32 %v246_v27, %v245_v23 }
  0x67   : > { %v258_v32 = vrot.slane %v257_v28, 2 }
  0x68   : > { %v241_v33 = vadd.f32 %v240_v29, %v239_v26  ;;  %v248_v34 = vrot.slane %v247_v30, 1 }
  0x69   : > { %v259_v35 = vadd.f32 %v258_v32, %v257_v28 }
  0x6a   : > { %v242_v36 = vrot.slane %v241_v33, 1  ;;  %v249_v37 = vadd.f32 %v248_v34, %v247_v30 }
  0x6b   : > { %v260_v39 = vrot.slane %v259_v35, 1 }
  0x6c   : > { %v243_v40 = vadd.f32 %v242_v36, %v241_v33 }
  0x6d   : > { %v261_v41 = vadd.f32 %v260_v39, %v259_v35 }
  0x6e   : > { %v263_v43 = vsel %vm262_vm1, %v243_v40, %v249_v37 }
  0x6f   : > { %v265_v44 = vsel %vm264_vm2, %v263_v43, %v255_v38 }
  0x70   : > { %v267_v45 = vsel %vm266_vm3, %v265_v44, %v261_v41 }
  0x71   : > { %v269_v46 = vadd.f32 %v267_v45, %v219_v42 }
  0x73   : > { %270 = vst [vmem:[%s761_s19] sm:$0xf] %v269_v46 }
  0x74   : > { %547 = shalt.err (!%p544_p6)
}
  0x75   : > { %s548_s6 = scalar_lea.hbm %s283_s3, 64  ;;  %s552_s27 = scalar_lea.hbm %s809_s2, 128 }
  0x76   : > { %p549_p7 = scmp.ne.s32.totalorder %s283_s3, %s548_s6  ;;  %p553_p4 = scmp.lt.s32.totalorder %s283_s3, %s809_s2 }
  0x77   : > { %p554_p10 = scmp.lt.s32.totalorder %s552_s27, %s548_s6 }
  0x78   : > { %p550_p1 = pnand %p549_p7, %p690_p9 }
  0x79   : > { %p555_p8 = por %p554_p10, %p553_p4 }
  0x7a   : > { %p551_p2 = pneg %p550_p1 }
  0x7c   : > { %p556_p0 = pnand %p555_p8, %p551_p2 }
  0x7e   : > { %559 = shalt.err (!%p556_p0)
}
  0x7f   : > { %408 = dma.vmem_to_hbm [thread:$0]  (%p690_p9), %s286_s20, 64, %s283_s3, %s272_s7  }
  0x80 PF: > { %s297_s16 = sand.u32 1, %s598_s9   ;;  %p816_p3 = scmp.ge.s32.totalorder %s618_s14, 2 }
  0x81   : > { %s298_s18 = scalar_lea.sflag [#allocation4], %s297_s16 }
  0x82   : > { %p418_p13 = pnand %p816_p3, %p697_p11 }
  0x84   : > { %p419_p5 = pneg %p418_p13 }
  0x86   : > { %593 = dma.done.wait (%p419_p5), %s298_s18, 64  }
  0x87   : > { %595 = vsyncadd (%p419_p5), %s298_s18, 4294967232  ;;  %s21_s14 = sadd.s32 1, %s618_s14   ;;  %s817_s9 = smov %s602_s10 }
  0x88   : > { %p18_p12 = scmp.ge.s32.totalorder %s21_s14, 4   ;;  %s818_s10 = smov %s606_s11 }
  0x89   : > { %s819_s11 = smov %s695_s23  ;;  %s820_s12 = smov %s614_s13 }
  0x8a   : > { %s821_s13 = smov %s823_s17  ;;  %20 = sbr.rel (!%p18_p12) target bundleno = 8 (0x8), region = 90 }
  0x8f   :  { %303 = vsyncpa [#allocation3], 1 }
  0x90   :  { %305 = vsyncpa [#allocation3 + $0x1], 1 }
  0x91   :  { %306 = vsyncpa [#allocation6], 1 }
  0x92   :  { %308 = vsyncpa [#allocation6 + $0x1], 1 }
  0x93   :  { %309 = vsyncpa [#allocation4], 1 }
  0x94   :  { %311 = vsyncpa [#allocation4 + $0x1], 1 }

</bundles_post_ra>
